<compile_context>
chip_gen: v7x
topology: tpu7x:2x2x1
jax: 0.10.0
libtpu: 0.0.40
codegen_flags: <defaults>
</compile_context>

<pallas_src>
import functools

import jax
import jax.numpy as jnp
from jax.experimental import pallas as pl
from jax.experimental.pallas import tpu as pltpu


def _round_up(v: int, m: int) -> int:
    return (v + m - 1) // m * m


def _wavenet_kernel(
    x_main_ref,   # (1, T_tile, C)    residual-stream input, this tile
    x_halo_ref,   # (1, 2*HALO, C)    first 2*HALO rows of the next tile region
    d_main_ref,   # (1, T_tile, Cd)   diffusion-step input, this tile
    d_halo_ref,   # (1, 2*HALO, Cd)
    cond_ref,     # (1, T_tile, Cc)
    mask_ref,     # (1, T_tile, 1)
    w_dstep_ref,  # (Cd, C)
    b_dstep_ref,  # (1, C)            float32
    w_all_ref,    # (K*C + Cc, 2C)    packed [conv taps ; condition]
    b_all_ref,    # (1, 2C)           b_conv + b_cond (float32)
    out_ref,      # (1, T_tile, 2C)   [:, :, :C] = gated + residual, [:, :, C:] = gated
    *,
    kernel_size: int,
    dilation: int,
    pad: int,
    halo: int,
    t_tile: int,
    seq_len: int,
):
    f32 = jnp.float32
    mm_dtype = w_all_ref.dtype          # storage/MXU dtype (f32 or bf16)
    C = x_main_ref.shape[2]

    # Assemble the halo'd window [T_tile + 2*halo, .] for x and diffusion steps.
    x_win = jnp.concatenate([x_main_ref[0], x_halo_ref[0]], axis=0)
    d_win = jnp.concatenate([d_main_ref[0], d_halo_ref[0]], axis=0)

    # diffusion_step: 1x1 conv over the window (f32 accumulate), add to stream.
    d = (
        jnp.dot(d_win, w_dstep_ref[...], preferred_element_type=f32)
        + b_dstep_ref[...]
    )
    xd = x_win.astype(f32) + d          # [T_tile + 2*halo, C]

    # Zero rows that fall inside the dilated conv's zero-padding region
    # (original time < 0 or >= seq_len).  PyTorch pads the post-dstep signal
    # with zeros, so b_dstep must NOT leak into the padding.
    t0 = pl.program_id(1) * t_tile - halo
    row = jax.lax.broadcasted_iota(jnp.int32, (t_tile + 2 * halo, 1), 0) + t0
    xd = jnp.where(jnp.logical_and(row >= 0, row < seq_len), xd, 0.0)

    # Cast ONCE to the MXU dtype, then slice the K taps and append the
    # condition block (already mm_dtype) -> deep operand [T_tile, K*C + Cc]
    # in mm_dtype (no f32 temporary, no f32 round-trip on conditions).
    xd_m = xd.astype(mm_dtype)
    base = halo - pad
    parts = [
        xd_m[base + k * dilation: base + k * dilation + t_tile, :]
        for k in range(kernel_size)
    ]
    parts.append(cond_ref[0])
    m = jnp.concatenate(parts, axis=-1)

    # ONE fused deep matmul producing both gate halves (full 2C output width).
    acc = jnp.dot(m, w_all_ref[...], preferred_element_type=f32) + b_all_ref[...]

    # Fused_Gate + mask (dropout p=0 -> identity); elementwise math in f32.
    gated = (
        jnp.tanh(acc[:, :C]) * jax.nn.sigmoid(acc[:, C:])
        * mask_ref[0].astype(f32)
    )
    resid = x_win[halo: halo + t_tile, :].astype(f32)

    # Two direct sliced stores into the lane-dense (1, T_tile, 2C) slab.
    out_ref[0, :, :C] = (gated + resid).astype(out_ref.dtype)
    out_ref[0, :, C:] = gated.astype(out_ref.dtype)


def wavenet_forward(x, masks, conditions, diffusion_steps, params,
                    *, kernel_size, dilation, t_tile=256, dtype=jnp.bfloat16):
    """x:[B,C,T] masks:[B,1,T] conditions:[B,Cc,T] diffusion_steps:[B,Cd,T] (NCL).

    `dtype` is the storage/MXU dtype (bfloat16 by default; accumulation stays
    float32).  Sweep t_tile up to 512-1024 on v5e/v6e (128 MiB VMEM); keep
    t_tile <= 256 on v7x unless running bf16."""
    B, C, T = x.shape
    Cc = conditions.shape[1]
    Cd = diffusion_steps.shape[1]

    if (kernel_size - 1) * dilation % 2 != 0:
        # PyTorch 'same'-style padding only symmetric for even (k-1)*dilation.
        raise ValueError("(kernel_size - 1) * dilation must be even")
    pad = (kernel_size - 1) * dilation // 2

    # Halo rows fetched per tile (rounded for sublane alignment, incl. bf16).
    halo = _round_up(max(pad, 1), 8)
    hb = 2 * halo

    # Time tile: multiple of the halo block, >= one halo block, <= needed span.
    tt = max(t_tile, hb)
    tt = (tt // hb) * hb
    tt = max(min(tt, _round_up(T, hb)), hb)
    n_t = pl.cdiv(T, tt)
    t_round = n_t * tt
    ext_len = t_round + hb          # only ONE halo block past the last tile
    hblocks = tt // hb              # halo-sized blocks per time tile

    # NCL -> [B, T, C]  (channels last = lanes), cast to storage dtype, pad T.
    x_t = jnp.transpose(x, (0, 2, 1)).astype(dtype)
    d_t = jnp.transpose(diffusion_steps, (0, 2, 1)).astype(dtype)
    c_t = jnp.transpose(conditions, (0, 2, 1)).astype(dtype)
    m_t = jnp.transpose(masks, (0, 2, 1)).astype(dtype)

    x_h = jnp.pad(x_t, ((0, 0), (halo, ext_len - T - halo), (0, 0)))
    d_h = jnp.pad(d_t, ((0, 0), (halo, ext_len - T - halo), (0, 0)))
    c_p = jnp.pad(c_t, ((0, 0), (0, t_round - T), (0, 0)))
    m_p = jnp.pad(m_t, ((0, 0), (0, t_round - T), (0, 0)))

    # Pack conv-tap + condition weights into ONE (K*C + Cc, 2C) matrix; fold
    # b_cond into b_conv.
    w_conv = params["w_conv"]    # (K, C, 2C)
    w_cond = params["w_cond"]    # (Cc, 2C)
    kc = kernel_size * C + Cc
    w_all = jnp.concatenate(
        [w_conv.reshape(kernel_size * C, 2 * C), w_cond], axis=0).astype(dtype)
    b_all = (params["b_conv"] + params["b_cond"]).astype(jnp.float32)  # (1, 2C)
    w_dstep = params["w_dstep"].astype(dtype)        # (Cd, C)
    b_dstep = params["b_dstep"].astype(jnp.float32)  # (1, C)

    kernel = functools.partial(
        _wavenet_kernel,
        kernel_size=kernel_size, dilation=dilation,
        pad=pad, halo=halo, t_tile=tt, seq_len=T,
    )

    grid_spec = pltpu.PrefetchScalarGridSpec(
        num_scalar_prefetch=0,
        grid=(B, n_t),
        in_specs=[
            pl.BlockSpec((1, tt, C), lambda b, t: (b, t, 0)),                    # x main
            pl.BlockSpec((1, hb, C), lambda b, t: (b, (t + 1) * hblocks, 0)),    # x halo
            pl.BlockSpec((1, tt, Cd), lambda b, t: (b, t, 0)),                   # dstep main
            pl.BlockSpec((1, hb, Cd), lambda b, t: (b, (t + 1) * hblocks, 0)),   # dstep halo
            pl.BlockSpec((1, tt, Cc), lambda b, t: (b, t, 0)),                   # conditions
            pl.BlockSpec((1, tt, 1), lambda b, t: (b, t, 0)),                    # masks
            pl.BlockSpec((Cd, C), lambda b, t: (0, 0)),                          # w_dstep
            pl.BlockSpec((1, C), lambda b, t: (0, 0)),                           # b_dstep
            pl.BlockSpec((kc, 2 * C), lambda b, t: (0, 0)),                      # w_all
            pl.BlockSpec((1, 2 * C), lambda b, t: (0, 0)),                       # b_all
        ],
        out_specs=pl.BlockSpec((1, tt, 2 * C), lambda b, t: (b, t, 0)),
    )

    out = pl.pallas_call(
        kernel,
        out_shape=jax.ShapeDtypeStruct((B, t_round, 2 * C), dtype),
        grid_spec=grid_spec,
        compiler_params=pltpu.CompilerParams(
            dimension_semantics=("parallel", "parallel"),
            vmem_limit_bytes=48 * 1024 * 1024,   # headroom on v7x's 64 MiB
        ),
    )(x_h, x_h, d_h, d_h, c_p, m_p, w_dstep, b_dstep, w_all, b_all)

    # Split the combined slab and go back to NCL.
    out_skip = jnp.transpose(out[:, :T, :C], (0, 2, 1)).astype(x.dtype)
    out_gate = jnp.transpose(out[:, :T, C:], (0, 2, 1)).astype(x.dtype)
    return out_skip, out_gate


def _reference_forward(x, masks, conditions, diffusion_steps, params,
                       *, kernel_size, dilation):
    """Pure-JAX reference (NCL, mirrors the PyTorch module) for validation."""
    pad = (kernel_size - 1) * dilation // 2
    residuals = x
    d = jnp.einsum("dc,bdt->bct", params["w_dstep"], diffusion_steps) \
        + params["b_dstep"][0][None, :, None]
    xd = x + d
    xd_p = jnp.pad(xd, ((0, 0), (0, 0), (pad, pad)))
    T = x.shape[-1]
    acc = params["b_conv"][0][None, :, None]
    for k in range(kernel_size):
        acc = acc + jnp.einsum(
            "co,bct->bot", params["w_conv"][k],
            jax.lax.dynamic_slice_in_dim(xd_p, k * dilation, T, axis=2))
    acc = acc + jnp.einsum("co,bct->bot", params["w_cond"], conditions) \
        + params["b_cond"][0][None, :, None]
    C = x.shape[1]
    gated = jnp.tanh(acc[:, :C]) * jax.nn.sigmoid(acc[:, C:])
    gated = gated * masks
    return gated + residuals, gated


if __name__ == "__main__":
    # Small, module-consistent shapes; T spans multiple time tiles so the
    # halo handling (and the conv-padding masking) across tile boundaries is
    # exercised.
    B, C, T = 2, 8, 48
    condition_channels = 8
    diffusion_step_channels = 8
    kernel_size, dilation = 3, 2

    key = jax.random.PRNGKey(0)
    ks = jax.random.split(key, 10)

    x = jax.random.normal(ks[0], (B, C, T), jnp.float32)
    masks = (jax.random.uniform(ks[1], (B, 1, T)) > 0.2).astype(jnp.float32)
    conditions = jax.random.normal(ks[2], (B, condition_channels, T), jnp.float32)
    diffusion_steps = jax.random.normal(
        ks[3], (B, diffusion_step_channels, T), jnp.float32)

    # Deterministic synthetic parameters (shapes from the module __init__).
    params = {
        # conv: Conv1d(C -> 2C, kernel_size, dilation)  -> per-tap [C, 2C]
        "w_conv": 0.1 * jax.random.normal(ks[4], (kernel_size, C, 2 * C), jnp.float32),
        "b_conv": 0.1 * jax.random.normal(ks[5], (1, 2 * C), jnp.float32),
        # condition: Conv1d(Cc -> 2C, k=1)  -> [Cc, 2C]
        "w_cond": 0.1 * jax.random.normal(ks[6], (condition_channels, 2 * C), jnp.float32),
        "b_cond": 0.1 * jax.random.normal(ks[7], (1, 2 * C), jnp.float32),
        # diffusion_step: Conv1d(Cd -> C, k=1)  -> [Cd, C]
        "w_dstep": 0.1 * jax.random.normal(ks[8], (diffusion_step_channels, C), jnp.float32),
        "b_dstep": 0.1 * jax.random.normal(ks[9], (1, C), jnp.float32),
    }

    out_skip, out_gate = wavenet_forward(
        x, masks, conditions, diffusion_steps, params,
        kernel_size=kernel_size, dilation=dilation,
        t_tile=16,                 # small tile so the test uses several tiles
        dtype=jnp.float32)         # bf16 default is the production setting
    jax.block_until_ready((out_skip, out_gate))

    ref_skip, ref_gate = _reference_forward(
        x, masks, conditions, diffusion_steps, params,
        kernel_size=kernel_size, dilation=dilation)

    assert out_skip.shape == (B, C, T) and out_gate.shape == (B, C, T)
    assert jnp.allclose(out_skip, ref_skip, atol=2e-4, rtol=2e-4)
    assert jnp.allclose(out_gate, ref_gate, atol=2e-4, rtol=2e-4)

    print("KERNEL_OK")
</pallas_src>

<mosaic_0001>
module attributes {stable_mosaic.version = 11 : i64} {
  func.func @_wavenet_kernel(%arg0: i32, %arg1: i32, %arg2: memref<1x16x8xf32, #tpu.memory_space<vmem>>, %arg3: memref<1x16x8xf32, #tpu.memory_space<vmem>>, %arg4: memref<1x16x8xf32, #tpu.memory_space<vmem>>, %arg5: memref<1x16x8xf32, #tpu.memory_space<vmem>>, %arg6: memref<1x16x8xf32, #tpu.memory_space<vmem>>, %arg7: memref<1x16x1xf32, #tpu.memory_space<vmem>>, %arg8: memref<8x8xf32, #tpu.memory_space<vmem>>, %arg9: memref<1x8xf32, #tpu.memory_space<vmem>>, %arg10: memref<32x16xf32, #tpu.memory_space<vmem>>, %arg11: memref<1x16xf32, #tpu.memory_space<vmem>>, %arg12: memref<1x16x16xf32, #tpu.memory_space<vmem>>) attributes {dimension_semantics = [#tpu.dimension_semantics<parallel>, #tpu.dimension_semantics<parallel>], iteration_bounds = array<i64: 2, 3>, scalar_prefetch = 0 : i64, scratch_operands = 0 : i64, tpu.core_type = #tpu.core_type<tc>, window_params = [{transform_indices = @transform_0, window_bounds = array<i64: 1, 16, 8>}, {transform_indices = @transform_1, window_bounds = array<i64: 1, 16, 8>}, {transform_indices = @transform_2, window_bounds = array<i64: 1, 16, 8>}, {transform_indices = @transform_3, window_bounds = array<i64: 1, 16, 8>}, {transform_indices = @transform_4, window_bounds = array<i64: 1, 16, 8>}, {transform_indices = @transform_5, window_bounds = array<i64: 1, 16, 1>}, {pipeline_mode = #tpu.pipeline_mode<synchronous>, transform_indices = @transform_6, window_bounds = array<i64: 8, 8>}, {pipeline_mode = #tpu.pipeline_mode<synchronous>, transform_indices = @transform_7, window_bounds = array<i64: 1, 8>}, {pipeline_mode = #tpu.pipeline_mode<synchronous>, transform_indices = @transform_8, window_bounds = array<i64: 32, 16>}, {pipeline_mode = #tpu.pipeline_mode<synchronous>, transform_indices = @transform_9, window_bounds = array<i64: 1, 16>}, {transform_indices = @transform_10, window_bounds = array<i64: 1, 16, 16>}]} {
    %c0 = arith.constant 0 : index
    %c0_0 = arith.constant 0 : index
    %c0_1 = arith.constant 0 : index
    %0 = vector.load %arg2[%c0, %c0_0, %c0_1] : memref<1x16x8xf32, #tpu.memory_space<vmem>>, vector<1x16x8xf32>
    %1 = vector.shape_cast %0 : vector<1x16x8xf32> to vector<16x8xf32>
    %c0_2 = arith.constant 0 : index
    %c0_3 = arith.constant 0 : index
    %c0_4 = arith.constant 0 : index
    %2 = vector.load %arg3[%c0_2, %c0_3, %c0_4] : memref<1x16x8xf32, #tpu.memory_space<vmem>>, vector<1x16x8xf32>
    %3 = vector.shape_cast %2 : vector<1x16x8xf32> to vector<16x8xf32>
    %4 = tpu.concatenate %1, %3 in 0 : vector<16x8xf32>, vector<16x8xf32> -> vector<32x8xf32>
    %c0_5 = arith.constant 0 : index
    %c0_6 = arith.constant 0 : index
    %c0_7 = arith.constant 0 : index
    %5 = vector.load %arg4[%c0_5, %c0_6, %c0_7] : memref<1x16x8xf32, #tpu.memory_space<vmem>>, vector<1x16x8xf32>
    %6 = vector.shape_cast %5 : vector<1x16x8xf32> to vector<16x8xf32>
    %c0_8 = arith.constant 0 : index
    %c0_9 = arith.constant 0 : index
    %c0_10 = arith.constant 0 : index
    %7 = vector.load %arg5[%c0_8, %c0_9, %c0_10] : memref<1x16x8xf32, #tpu.memory_space<vmem>>, vector<1x16x8xf32>
    %8 = vector.shape_cast %7 : vector<1x16x8xf32> to vector<16x8xf32>
    %9 = tpu.concatenate %6, %8 in 0 : vector<16x8xf32>, vector<16x8xf32> -> vector<32x8xf32>
    %c0_11 = arith.constant 0 : index
    %c0_12 = arith.constant 0 : index
    %10 = vector.load %arg8[%c0_11, %c0_12] : memref<8x8xf32, #tpu.memory_space<vmem>>, vector<8x8xf32>
    %cst = arith.constant dense<0.000000e+00> : vector<32x8xf32>
    %11 = tpu.matmul %9, %10, %cst {dimension_numbers = #tpu.dot_dimension_numbers<[1], [0], [0], [1], [0, 0, 1, 1], [], []>} : vector<32x8xf32>, vector<8x8xf32>, vector<32x8xf32> -> vector<32x8xf32>
    %c0_13 = arith.constant 0 : index
    %c0_14 = arith.constant 0 : index
    %12 = vector.load %arg9[%c0_13, %c0_14] : memref<1x8xf32, #tpu.memory_space<vmem>>, vector<1x8xf32>
    %13 = vector.broadcast %12 : vector<1x8xf32> to vector<32x8xf32>
    %14 = arith.addf %11, %13 : vector<32x8xf32>
    %15 = arith.addf %4, %14 : vector<32x8xf32>
    %c16_i32 = arith.constant 16 : i32
    %16 = arith.muli %arg1, %c16_i32 : i32
    %c8_i32 = arith.constant 8 : i32
    %17 = arith.subi %16, %c8_i32 : i32
    %18 = tpu.iota {dimensions = array<i32: 0>} : vector<32x1xi32>
    %19 = vector.broadcast %17 : i32 to vector<32x1xi32>
    %20 = arith.addi %18, %19 : vector<32x1xi32>
    %c0_i32 = arith.constant 0 : i32
    %21 = vector.broadcast %c0_i32 : i32 to vector<32x1xi32>
    %22 = arith.cmpi sge, %20, %21 : vector<32x1xi32>
    %c48_i32 = arith.constant 48 : i32
    %23 = vector.broadcast %c48_i32 : i32 to vector<32x1xi32>
    %24 = arith.cmpi slt, %20, %23 : vector<32x1xi32>
    %25 = arith.andi %22, %24 : vector<32x1xi1>
    %cst_15 = arith.constant 0.000000e+00 : f32
    %26 = vector.shape_cast %25 : vector<32x1xi1> to vector<32x1xi1>
    %27 = vector.broadcast %26 : vector<32x1xi1> to vector<32x8xi1>
    %28 = vector.broadcast %cst_15 : f32 to vector<32x8xf32>
    %29 = arith.select %27, %15, %28 : vector<32x8xi1>, vector<32x8xf32>
    %30 = vector.extract_strided_slice %29 {offsets = [6, 0], sizes = [16, 8], strides = [1, 1]} : vector<32x8xf32> to vector<16x8xf32>
    %31 = vector.extract_strided_slice %29 {offsets = [8, 0], sizes = [16, 8], strides = [1, 1]} : vector<32x8xf32> to vector<16x8xf32>
    %32 = vector.extract_strided_slice %29 {offsets = [10, 0], sizes = [16, 8], strides = [1, 1]} : vector<32x8xf32> to vector<16x8xf32>
    %c0_16 = arith.constant 0 : index
    %c0_17 = arith.constant 0 : index
    %c0_18 = arith.constant 0 : index
    %33 = vector.load %arg6[%c0_16, %c0_17, %c0_18] : memref<1x16x8xf32, #tpu.memory_space<vmem>>, vector<1x16x8xf32>
    %34 = vector.shape_cast %33 : vector<1x16x8xf32> to vector<16x8xf32>
    %35 = tpu.concatenate %30, %31, %32, %34 in 1 : vector<16x8xf32>, vector<16x8xf32>, vector<16x8xf32>, vector<16x8xf32> -> vector<16x32xf32>
    %c0_19 = arith.constant 0 : index
    %c0_20 = arith.constant 0 : index
    %36 = vector.load %arg10[%c0_19, %c0_20] : memref<32x16xf32, #tpu.memory_space<vmem>>, vector<32x16xf32>
    %cst_21 = arith.constant dense<0.000000e+00> : vector<16x16xf32>
    %37 = tpu.matmul %35, %36, %cst_21 {dimension_numbers = #tpu.dot_dimension_numbers<[1], [0], [0], [1], [0, 0, 1, 1], [], []>} : vector<16x32xf32>, vector<32x16xf32>, vector<16x16xf32> -> vector<16x16xf32>
    %c0_22 = arith.constant 0 : index
    %c0_23 = arith.constant 0 : index
    %38 = vector.load %arg11[%c0_22, %c0_23] : memref<1x16xf32, #tpu.memory_space<vmem>>, vector<1x16xf32>
    %39 = vector.broadcast %38 : vector<1x16xf32> to vector<16x16xf32>
    %40 = arith.addf %37, %39 : vector<16x16xf32>
    %41 = vector.extract_strided_slice %40 {offsets = [0, 0], sizes = [16, 8], strides = [1, 1]} : vector<16x16xf32> to vector<16x8xf32>
    %42 = math.tanh %41 : vector<16x8xf32>
    %43 = vector.extract_strided_slice %40 {offsets = [0, 8], sizes = [16, 8], strides = [1, 1]} : vector<16x16xf32> to vector<16x8xf32>
    %44 = arith.negf %43 : vector<16x8xf32>
    %45 = math.exp %44 : vector<16x8xf32>
    %cst_24 = arith.constant 1.000000e+00 : f32
    %46 = vector.broadcast %cst_24 : f32 to vector<16x8xf32>
    %47 = arith.addf %46, %45 : vector<16x8xf32>
    %48 = arith.divf %46, %47 : vector<16x8xf32>
    %49 = arith.mulf %42, %48 : vector<16x8xf32>
    %c0_25 = arith.constant 0 : index
    %c0_26 = arith.constant 0 : index
    %c0_27 = arith.constant 0 : index
    %50 = vector.load %arg7[%c0_25, %c0_26, %c0_27] : memref<1x16x1xf32, #tpu.memory_space<vmem>>, vector<1x16x1xf32>
    %51 = vector.shape_cast %50 : vector<1x16x1xf32> to vector<16x1xf32>
    %52 = vector.broadcast %51 : vector<16x1xf32> to vector<16x8xf32>
    %53 = arith.mulf %49, %52 : vector<16x8xf32>
    %54 = vector.extract_strided_slice %4 {offsets = [8, 0], sizes = [16, 8], strides = [1, 1]} : vector<32x8xf32> to vector<16x8xf32>
    %55 = arith.addf %53, %54 : vector<16x8xf32>
    %c0_28 = arith.constant 0 : index
    %c0_29 = arith.constant 0 : index
    %c0_30 = arith.constant 0 : index
    %56 = vector.load %arg12[%c0_28, %c0_29, %c0_30] : memref<1x16x16xf32, #tpu.memory_space<vmem>>, vector<1x16x8xf32>
    %57 = vector.shape_cast %56 : vector<1x16x8xf32> to vector<16x8xf32>
    %58 = vector.shape_cast %55 : vector<16x8xf32> to vector<1x16x8xf32>
    tpu.vector_store %arg12[%c0_28, %c0_29, %c0_30], %58 {strides = array<i32>} : memref<1x16x16xf32, #tpu.memory_space<vmem>>, vector<1x16x8xf32>,
    %c0_31 = arith.constant 0 : index
    %c0_32 = arith.constant 0 : index
    %c8 = arith.constant 8 : index
    %59 = vector.load %arg12[%c0_31, %c0_32, %c8] : memref<1x16x16xf32, #tpu.memory_space<vmem>>, vector<1x16x8xf32>
    %60 = vector.shape_cast %59 : vector<1x16x8xf32> to vector<16x8xf32>
    %61 = vector.shape_cast %53 : vector<16x8xf32> to vector<1x16x8xf32>
    tpu.vector_store %arg12[%c0_31, %c0_32, %c8], %61 {strides = array<i32>} : memref<1x16x16xf32, #tpu.memory_space<vmem>>, vector<1x16x8xf32>,
    return
  }
  func.func @transform_0(%arg0: i32, %arg1: i32) -> (i32, i32, i32) {
    %c0_i32 = arith.constant 0 : i32
    %c0_i32_0 = arith.constant 0 : i32
    return %arg0, %arg1, %c0_i32 : i32, i32, i32
  }
  func.func @transform_1(%arg0: i32, %arg1: i32) -> (i32, i32, i32) {
    %c1_i32 = arith.constant 1 : i32
    %0 = arith.addi %arg1, %c1_i32 : i32
    %c1_i32_0 = arith.constant 1 : i32
    %1 = arith.muli %0, %c1_i32_0 : i32
    %c0_i32 = arith.constant 0 : i32
    %c0_i32_1 = arith.constant 0 : i32
    return %arg0, %1, %c0_i32 : i32, i32, i32
  }
  func.func @transform_2(%arg0: i32, %arg1: i32) -> (i32, i32, i32) {
    %c0_i32 = arith.constant 0 : i32
    %c0_i32_0 = arith.constant 0 : i32
    return %arg0, %arg1, %c0_i32 : i32, i32, i32
  }
  func.func @transform_3(%arg0: i32, %arg1: i32) -> (i32, i32, i32) {
    %c1_i32 = arith.constant 1 : i32
    %0 = arith.addi %arg1, %c1_i32 : i32
    %c1_i32_0 = arith.constant 1 : i32
    %1 = arith.muli %0, %c1_i32_0 : i32
    %c0_i32 = arith.constant 0 : i32
    %c0_i32_1 = arith.constant 0 : i32
    return %arg0, %1, %c0_i32 : i32, i32, i32
  }
  func.func @transform_4(%arg0: i32, %arg1: i32) -> (i32, i32, i32) {
    %c0_i32 = arith.constant 0 : i32
    %c0_i32_0 = arith.constant 0 : i32
    return %arg0, %arg1, %c0_i32 : i32, i32, i32
  }
  func.func @transform_5(%arg0: i32, %arg1: i32) -> (i32, i32, i32) {
    %c0_i32 = arith.constant 0 : i32
    %c0_i32_0 = arith.constant 0 : i32
    return %arg0, %arg1, %c0_i32 : i32, i32, i32
  }
  func.func @transform_6(%arg0: i32, %arg1: i32) -> (i32, i32) {
    %c0_i32 = arith.constant 0 : i32
    %c0_i32_0 = arith.constant 0 : i32
    %c0_i32_1 = arith.constant 0 : i32
    return %c0_i32, %c0_i32_0 : i32, i32
  }
  func.func @transform_7(%arg0: i32, %arg1: i32) -> (i32, i32) {
    %c0_i32 = arith.constant 0 : i32
    %c0_i32_0 = arith.constant 0 : i32
    %c0_i32_1 = arith.constant 0 : i32
    return %c0_i32, %c0_i32_0 : i32, i32
  }
  func.func @transform_8(%arg0: i32, %arg1: i32) -> (i32, i32) {
    %c0_i32 = arith.constant 0 : i32
    %c0_i32_0 = arith.constant 0 : i32
    %c0_i32_1 = arith.constant 0 : i32
    return %c0_i32, %c0_i32_0 : i32, i32
  }
  func.func @transform_9(%arg0: i32, %arg1: i32) -> (i32, i32) {
    %c0_i32 = arith.constant 0 : i32
    %c0_i32_0 = arith.constant 0 : i32
    %c0_i32_1 = arith.constant 0 : i32
    return %c0_i32, %c0_i32_0 : i32, i32
  }
  func.func @transform_10(%arg0: i32, %arg1: i32) -> (i32, i32, i32) {
    %c0_i32 = arith.constant 0 : i32
    %c0_i32_0 = arith.constant 0 : i32
    return %arg0, %arg1, %c0_i32 : i32, i32, i32
  }
}

</mosaic_0001>

<bundles_post_ra>
// kernel: tpu_custom_call.1
= control target key start
LH: loop header
LB: loop body
LE: loop exit
PB: predicated region body
PF: predicated region fallthrough
CT: control target
= control target key end

     0   :  { %s1377_s13 = smov 0   ;;  %s1379_s14 = smov 0   ;;  %s1538_s0 = inlined_call_operand.vmem [shape: f32[2,64,8], index: 0, kind: input, shape index: {}]   ;;  %s1539_s1 = inlined_call_operand.vmem [shape: f32[2,64,8], index: 1, kind: input, shape index: {}]   ;;  %s1540_s2 = inlined_call_operand.vmem [shape: f32[2,64,8], index: 2, kind: input, shape index: {}]   ;;  %s1541_s3 = inlined_call_operand.vmem [shape: f32[2,64,8], index: 3, kind: input, shape index: {}]   ;;  %s1542_s4 = inlined_call_operand.vmem [shape: f32[2,48,8], index: 4, kind: input, shape index: {}]   ;;  %s1543_s5 = inlined_call_operand.vmem [shape: f32[2,48,1], index: 5, kind: input, shape index: {}]   ;;  %s1544_s6 = inlined_call_operand.vmem [shape: f32[8,8], index: 6, kind: input, shape index: {}]   ;;  %s1545_s7 = inlined_call_operand.vmem [shape: f32[1,8], index: 7, kind: input, shape index: {}]   ;;  %s1546_s8 = inlined_call_operand.vmem [shape: f32[32,16], index: 8, kind: input, shape index: {}]   ;;  %s1547_s9 = inlined_call_operand.vmem [shape: f32[1,16], index: 9, kind: input, shape index: {}]   ;;  %s1548_s10 = inlined_call_operand.vmem [shape: f32[2,48,16], index: 10, kind: output, shape index: {}]  }
   0x1   :  { %s1381_s15 = smov 0   ;;  %s1383_s16 = smov 0  }
   0x2   :  { %s1385_s17 = smov 0  }
   0x3 LB: > { %s29_s18 = sadd.s32 1, %s1307_s15  ;;  %s32_s19 = sadd.s32 1, %s1311_s16  ;;  %s1315_s17 = sphi %s1385_s17, %s20_s17   ;;  %s1311_s16 = sphi %s1383_s16, %s1558_s16   ;;  %s1307_s15 = sphi %s1381_s15, %s1557_s15   ;;  %s1303_s14 = sphi %s1379_s14, %s1556_s14   ;;  %s1299_s13 = sphi %s1377_s13, %s1555_s13  }
   0x4   : > { %p30_p0 = scmp.ge.s32.totalorder %s29_s18, 3  ;;  %p1142_p1 = scmp.ge.s32.totalorder %s1315_s17, 1 }
   0x5   : > { %p426_p2 = scmp.lt.s32.totalorder %s1315_s17, 7 }
   0x6   : > { %s1560_s18 = smov (%p30_p0, %s29_s18), 0  ;;  %s1562_s19 = smov (!%p30_p0, %s32_s19), %s1311_s16 }
   0x7   : > { %p427_p3 = pnand %p1142_p1, %p426_p2  ;;  %p34_p4 = scmp.ge.s32.totalorder %s1562_s19, 2 }
   0x8   : > { %v601_v0 = vld [vmem:[%s1544_s6] sm:$0xff] (!%p427_p3)  ;;  %s1143_s22 = sshll.u32 (!%p427_p3), %s1299_s13, 1  ;;  %p520_p5 = scmp.lt.s32.totalorder (!%p427_p3), %s1303_s14, 1  ;;  %vm609_vm0 = vcmask (!%p427_p3), 64512   ;;  %v713_v5 = vlaneseq (!%p427_p3)  ;;  %vm751_vm1 = vcmask (!%p427_p3), 1045504   ;;  %v806_v30 = vld [vmem:[%s1546_s8 + $0x8] sm:$0xff] (!%p427_p3) }
   0x9   : > { %s1564_s19 = smov (%p34_p4, %s1562_s19), 0  ;;  %430 = sbr.rel (%p427_p3) target bundleno = 856 (0x358), region = 60 }
   0xa   : > { %1190 = vmatprep.subr.mxu0 (!%p427_p3), %v601_v0  ;;  %p522_p6 = scmp.lt.s32.totalorder (!%p427_p3), %s1143_s22, 7  ;;  %s1176_s23 = sadd.s32 (!%p427_p3), 2, %s1143_s22  ;;  %v714_v6 = vshrl.u32 (!%p427_p3), %v713_v5, 7  ;;  %v1161_v18 = vld [vmem:[%s1545_s7] ss:$0 sm:$0xff] (!%p427_p3)  ;;  %v807_v44 = vld [vmem:[%s1546_s8 + $0x10] sm:$0xff] (!%p427_p3) }
   0xb   : > { %1191 = vmatpush3.msra.mxu0 (!%p427_p3), %v601_v0  ;;  %p533_p7 = scmp.lt.s32.totalorder (!%p427_p3), %s1176_s23, 7  ;;  %p566_p8 = scmp.lt.s32.totalorder (!%p427_p3), %s1143_s22, 5  ;;  %v805_v29 = vld [vmem:[%s1546_s8] sm:$0xff] (!%p427_p3)  ;;  %v808_v45 = vld [vmem:[%s1546_s8 + $0x18] sm:$0xff] (!%p427_p3)  ;;  %vm765_vm14 = vcmask (!%p427_p3), 1043456   ;;  %vm797_vm15 = vcmask (!%p427_p3), 130048  }
   0xc   : > { %v715_v14 = vadd.s32 (!%p427_p3), 8, %v714_v6  ;;  %v717_v16 = vadd.s32 (!%p427_p3), 24, %v714_v6  ;;  %v716_v17 = vadd.s32 (!%p427_p3), 16, %v714_v6  ;;  %v1209_v33 = vpack.c.bf16 (!%p427_p3), %v806_v30, %v805_v29  ;;  %s1321_s21 = smov (!%p427_p3), 120  }
   0xd   : > { %v1213_v47 = vpack.c.bf16 (!%p427_p3), %v808_v45, %v807_v44 }
   0xe   : > { %1210 = vmatprep.subr.bf16.mxu1 (!%p427_p3), %v1209_v33 }
   0xf   : > { %1212 = vmatpush3.bf16.msra.mxu1 (!%p427_p3), %v1209_v33 }
  0x10   : > { %s1566_s14 = smov (!%p520_p5, %s1303_s14), 1  ;;  %s1568_s23 = smov (!%p533_p7, %s1176_s23), 7  ;;  %1214 = vmatprep.subr.bf16.mxu1 %v1213_v47 }
  0x11   : > { %s523_s24 = scalar_select %p522_p6, %s1143_s22, 7 }
  0x12   : > { %s1144_s25 = sshll.u32 %s1566_s14, 3  ;;  %s1570_s22 = smov (!%p566_p8, %s1143_s22), 5 }
  0x13   : > { %s1413_s26 = sadd.s32 %s1144_s25, %s523_s24  ;;  %s1422_s11 = sadd.s32 %s1144_s25, %s1568_s23  ;;  %1216 = vmatpush3.bf16.msra.mxu1 %v1213_v47 }
  0x14   : > { %s1145_s27 = sshll.u32 %s1413_s26, 3  ;;  %s1549_s12 = sshll.u32 %s1422_s11, 3 }
  0x15   : > { %s549_s30 = scalar_lea.vmem %s1540_s2, %s1145_s27  ;;  %s560_s24 = scalar_lea.vmem %s1541_s3, %s1549_s12 }
  0x16   : > { %v597_v1 = vld [vmem:[%s549_s30] sm:$0xff]  ;;  %v598_v2 = vld [vmem:[%s549_s30 + $0x8] sm:$0xff]  ;;  %s1217_s23 = smul.u32 6, %s1566_s14  ;;  %s1166_s25 = sshll.u32 %s1299_s13, 4 }
  0x17   : > { %1192 = vmatprep.mubr.msk.f32.mxu0 %vm609_vm0, %v597_v1  ;;  %v599_v3 = vld [vmem:[%s560_s24] sm:$0xff]  ;;  %v600_v4 = vld [vmem:[%s560_s24 + $0x8] sm:$0xff]  ;;  %s1167_s29 = sadd.s32 4294967288, %s1166_s25  ;;  %s1317_s12 = smov 24  }
  0x18   : > { %1193 = vmatmul.mubr.msk.f32.vlgmr.msra.gmra.mrb[0].mxu0 %vm609_vm0, %v598_v2  ;;  %s569_s28 = sadd.s32 %s1217_s23, %s1570_s22  ;;  %v718_v7 = vstv %s1167_s29  ;;  %s527_s22 = scalar_lea.vmem %s1538_s0, %s1145_s27 }
  0x19   : > { %1195 = vmatprep.mubr.msk.f32.mxu0 %vm609_vm0, %v599_v3  ;;  %s1434_s30 = sshll.u32 %s569_s28, 3  ;;  %v719_v9 = vadd.s32 %v718_v7, %v714_v6  ;;  %v720_v15 = vadd.s32 %v718_v7, %v715_v14  ;;  %v1457_v19 = vld [vmem:[%s527_s22 + $0x8] sm:$0xff]  ;;  %v722_v21 = vadd.s32 %v718_v7, %v717_v16  ;;  %v593_v23 = vld [vmem:[%s527_s22] sm:$0xff]  ;;  %s1550_s26 = sshll.u32 %s1422_s11, 3  ;;  %v721_v25 = vadd.s32 %v718_v7, %v716_v17 }
  0x1a   : > { %s571_s24 = scalar_lea.vmem %s1542_s4, %s1434_s30  ;;  %s538_s27 = scalar_lea.vmem %s1539_s1, %s1550_s26  ;;  %v1320_v16 = vmov 0  }
  0x1b   : > { %v747_v8 = vld [vmem:[%s571_s24] sm:$0xff]  ;;  %v1441_v11 = vld [vmem:[%s571_s24 + $0x8] sm:$0xff]  ;;  %vm724_vm2 = vcmp.ge.s32.totalorder %v720_v15, 0  ;;  %vm728_vm3 = vcmp.lt.s32.totalorder %v720_v15, 48  ;;  %vm723_vm4 = vcmp.ge.s32.totalorder %v719_v9, 0  ;;  %vm727_vm5 = vcmp.lt.s32.totalorder %v719_v9, 48  ;;  %s581_s29 = scalar_lea.vmem %s1543_s5, %s1434_s30  ;;  %1263 = vset.pattern.permute.xlu1 %v1320_v16  ;;  %1264 = vset.pattern.permute.xlu0 %v1320_v16  ;;  %s591_s11 = scalar_lea.vmem %s1548_s10, %s1434_s30 }
  0x1c   : > { %1196 = vmatmul.mubr.msk.f32.gmra.mrb[2].mxu0 %vm609_vm0, %v600_v4  ;;  %v782_v10 = vrot.slane %v747_v8, 2  ;;  %v783_v12 = vrot.slane %v1441_v11, 2  ;;  %vm732_vm6 = vmand %vm724_vm2, %vm728_vm3  ;;  %v596_v32 = vld [vmem:[%s538_s27 + $0x8] sm:$0xff]  ;;  %vm726_vm8 = vcmp.ge.s32.totalorder %v722_v21, 0  ;;  %vm730_vm9 = vcmp.lt.s32.totalorder %v722_v21, 48  ;;  %v1475_v37 = vld [vmem:[%s538_s27] sm:$0xff] }
  0x1d   : > { %vm1465_vm7 = vmand %vm723_vm4, %vm727_vm5  ;;  %vm725_vm10 = vcmp.ge.s32.totalorder %v721_v25, 0  ;;  %vm729_vm11 = vcmp.lt.s32.totalorder %v721_v25, 48  ;;  %s1318_s25 = smov 16   ;;  %s1319_s26 = smov 8   ;;  %vm819_vm2 = vcmask 1041408   ;;  %vm825_vm3 = vcmask 261120  }
  0x1e   : > { %785 = vrot.lane.b32.xlu0 %v782_v10, %s1317_s12  ;;  %v1447_v13 = vsel %vm751_vm1, %v782_v10, %v783_v12  ;;  %vm1479_vm12 = vmand %vm726_vm8, %vm730_vm9  ;;  %v929_v17 = vld [vmem:[%s581_s29] sm:$0xff]  ;;  %vm955_vm4 = vcmask 130112  }
  0x1f   : > { %vm733_vm13 = vmand %vm725_vm10, %vm729_vm11 }
  0x90   : > { %v786_v57 = vpop.permute.xlu0 %785 }
  0xeb   : > { %v1194_v20 = vpop.f32.mrb[0].mxu0 }
  0xec   : > { %v694_v22 = vadd.f32 %v1194_v20, %v1161_v18  ;;  %v688_v24 = vpop.f32.mrb[1].mxu0  ;;  %v1168_v20 = vld [vmem:[%s1547_s9] ss:$0 sm:$0xff] }
  0xed   : > { %v689_v26 = vadd.f32 %v1161_v18, %v688_v24 }
  0xee   : > { %v708_v27 = vadd.f32 %v694_v22, %v1457_v19 }
  0xef   : > { %v707_v31 = vadd.f32 %v689_v26, %v593_v23  ;;  %v1197_v34 = vpop.f32.mrb[2].mxu0 }
  0xf0   : > { %v744_v35 = vsel %vm732_vm6, %v708_v27, 0.0  ;;  %v704_v36 = vadd.f32 %v1197_v34, %v1161_v18  ;;  %v698_v38 = vpop.f32.mrb[3].mxu0 }
  0xf1   : > { %v766_v39 = vrot.slane %v744_v35, 4  ;;  %v752_v40 = vrot.slane %v744_v35, 2  ;;  %v743_v41 = vsel %vm1465_vm7, %v707_v31, 0.0  ;;  %v699_v43 = vadd.f32 %v1161_v18, %v698_v38  ;;  %v930_v18 = vld [vmem:[%s581_s29 + $0x8] sm:$0xff] }
  0xf2   : > { %v710_v46 = vadd.f32 %v704_v36, %v596_v32 }
  0xf3   : > { %771 = vrot.lane.b32.xlu1 %v766_v39, %s1318_s25  ;;  %755 = vrot.lane.b32.xlu0 %v752_v40, %s1319_s26  ;;  %v709_v48 = vadd.f32 %v699_v43, %v1475_v37 }
  0xf4   : > { %v746_v49 = vsel %vm1479_vm12, %v710_v46, 0.0 }
  0xf5   : > { %v745_v50 = vsel %vm733_vm13, %v709_v48, 0.0  ;;  %v769_v52 = vrot.slane %v746_v49, 4 }
  0xf6   : > { %v753_v51 = vrot.slane %v745_v50, 2  ;;  %v767_v53 = vrot.slane %v745_v50, 4 }
  0xf8   : > { %759 = vrot.lane.b32.xlu1 %v753_v51, %s1319_s26  ;;  %v754_v54 = vsel %vm751_vm1, %v752_v40, %v753_v51  ;;  %v770_v55 = vsel %vm765_vm14, %v767_v53, %v769_v52  ;;  %v768_v56 = vsel %vm765_vm14, %v766_v39, %v767_v53  ;;  %vm801_vm1 = vcmask 195584  }
  0xf9   : > { %757 = vrot.lane.b32.xlu0 %v754_v54, %s1319_s26 }
  0xfc   : > { %775 = vrot.lane.b32.xlu1 %v770_v55, %s1318_s25 }
  0xfd   : > { %773 = vrot.lane.b32.xlu0 %v768_v56, %s1318_s25 }
 0x100   : > { %787 = vrot.lane.b32.xlu1 %v1447_v13, %s1317_s12 }
 0x101   : > { %789 = vrot.lane.b32.xlu0 %v783_v12, %s1317_s12 }
 0x104   : > { %933 = vperm.xlu1 %1263, %v929_v17  }
 0x105   : > { %938 = vperm.xlu0 %1264, %v930_v18  }
 0x165   : > { %v772_v58 = vpop.permute.xlu1 %771  ;;  %v756_v59 = vpop.permute.xlu0 %755 }
 0x166   : > { %v794_v61 = vsel %vm609_vm0, %v743_v41, %v756_v59 }
 0x167   : > { %v798_v63 = vsel %vm797_vm15, %v794_v61, %v772_v58 }
 0x168   : > { %v802_v3 = vsel %vm801_vm1, %v798_v63, %v786_v57 }
 0x169   : > { %v820_v12 = vrot.slane %v802_v3, 6 }
 0x16a   : > { %v760_v60 = vpop.permute.xlu1 %759 }
 0x16b   : > { %v758_v62 = vpop.permute.xlu0 %757  ;;  %v796_v4 = vsel %vm609_vm0, %v745_v50, %v760_v60 }
 0x16c   : > { %v795_v2 = vsel %vm609_vm0, %v744_v35, %v758_v62 }
 0x16e   : > { %v776_v0 = vpop.permute.xlu1 %775 }
 0x16f   : > { %v774_v1 = vpop.permute.xlu0 %773  ;;  %v800_v7 = vsel %vm797_vm15, %v796_v4, %v776_v0 }
 0x170   : > { %v799_v5 = vsel %vm797_vm15, %v795_v2, %v774_v1 }
 0x172   : > { %v788_v6 = vpop.permute.xlu1 %787 }
 0x173   : > { %v803_v8 = vsel %vm801_vm1, %v799_v5, %v788_v6  ;;  %v790_v9 = vpop.permute.xlu0 %789 }
 0x174   : > { %v821_v10 = vrot.slane %v803_v8, 6  ;;  %v804_v11 = vsel %vm801_vm1, %v800_v7, %v790_v9 }
 0x175   : > { %v823_v13 = vrot.slane %v804_v11, 6 }
 0x176   : > { %v822_v14 = vsel %vm819_vm2, %v820_v12, %v821_v10 }
 0x177   : > { %1206 = vmatprep.mubr.msk.f32.mxu1 %vm825_vm3, %v822_v14  ;;  %v824_v15 = vsel %vm819_vm2, %v821_v10, %v823_v13 }
 0x178   : > { %1207 = vmatmul.mubr.msk.f32.vlgmr.msra.gmra.mrb[0].mxu1 %vm825_vm3, %v824_v15 }
 0x183   : > { %v934_v33 = vpop.permute.xlu1 %933 }
 0x184   : > { %v939_v41 = vpop.permute.xlu0 %938 }
 0x24b   : > { %v1208_v21 = vpop.f32.mrb[0].mxu1 }
 0x24c   : > { %v902_v22 = vadd.f32 %v1208_v21, %v1168_v20  ;;  %v896_v23 = vpop.f32.mrb[1].mxu1 }
 0x24d   : > { %v897_v24 = vadd.f32 %v1168_v20, %v896_v23 }
 0x24e   : > { %v1172_v25 = vmul.f32 -1.442695, %v902_v22 }
 0x24f   : > { %v1171_v26 = vmul.f32 -1.442695, %v897_v24 }
 0x250   : > { %1265 = vpow2.f32 %v1172_v25 }
 0x251   : > { %1267 = vpow2.f32 %v1171_v26 }
 0x25a   : > { %v1266_v27 = vpop.eup %1265 }
 0x25b   : > { %v1268_v28 = vpop.eup %1267  ;;  %v914_v30 = vadd.f32 1.0, %v1266_v27 }
 0x25c   : > { %v913_v29 = vadd.f32 1.0, %v1268_v28 }
 0x25e   : > { %1269 = vrcp.f32 %v913_v29 }
 0x25f   : > { %1271 = vrcp.f32 %v914_v30 }
 0x260   : > { %1273 = vtanh.f32 %v897_v24 }
 0x261   : > { %1275 = vtanh.f32 %v902_v22 }
 0x268   : > { %v1270_v31 = vpop.eup %1269 }
 0x269   : > { %921 = vrot.lane.b32.xlu1 %v1270_v31, %s1321_s21  ;;  %v1272_v32 = vpop.eup %1271 }
 0x26a   : > { %v1274_v34 = vpop.eup %1273 }
 0x26b   : > { %v1276_v39 = vpop.eup %1275 }
 0x26d   : > { %923 = vrot.lane.b32.xlu1 %v1272_v32, %s1321_s21 }
 0x2db   : > { %v922_v35 = vpop.permute.xlu1 %921 }
 0x2dc   : > { %v927_v36 = vmul.f32 %v1274_v34, %v922_v35 }
 0x2de   : > { %v941_v38 = vmul.f32 %v934_v33, %v927_v36 }
 0x2df   : > { %v924_v40 = vpop.permute.xlu1 %923 }
 0x2e0   : > { %v943_v42 = vadd.f32 %v941_v38, %v1457_v19  ;;  %v928_v43 = vmul.f32 %v1276_v39, %v924_v40  ;;  %949 = vrot.lane.b32.xlu0 %v941_v38, %s1319_s26 }
 0x2e2   : > { %945 = vst.msk [vmem:[%s591_s11] sm:$0xff] %vm609_vm0, %v943_v42  ;;  %v942_v44 = vmul.f32 %v939_v41, %v928_v43 }
 0x2e4   : > { %v944_v45 = vadd.f32 %v942_v44, %v1475_v37  ;;  %951 = vrot.lane.b32.xlu1 %v942_v44, %s1319_s26 }
 0x2e6   : > { %946 = vst.msk [vmem:[%s591_s11 + $0x8] sm:$0xff] %vm609_vm0, %v944_v45 }
 0x352   : > { %v950_v46 = vpop.permute.xlu0 %949 }
 0x353   : > { %956 = vst.msk [vmem:[%s591_s11] sm:$0xff] %vm955_vm4, %v950_v46 }
 0x356   : > { %v952_v47 = vpop.permute.xlu1 %951 }
 0x357   : > { %957 = vst.msk [vmem:[%s591_s11 + $0x8] sm:$0xff] %vm955_vm4, %v952_v47 }
 0x358 PF: > { %s20_s17 = sadd.s32 1, %s1315_s17   ;;  %s1555_s13 = smov %s1307_s15 }
 0x359   : > { %p17_p9 = scmp.ge.s32.totalorder %s20_s17, 8   ;;  %s1556_s14 = smov %s1311_s16 }
 0x35a   : > { %s1557_s15 = smov %s1560_s18  ;;  %s1558_s16 = smov %s1564_s19 }
 0x35b   :  { %19 = sbr.rel (!%p17_p9) target bundleno = 3 (0x3), region = 105 }

</bundles_post_ra>
